<compile_context>
chip_gen: v7x
topology: tpu7x:2x2x1
jax: 0.10.0
libtpu: 0.0.40
codegen_flags: <defaults>
</compile_context>

<pallas_src>
import jax
import jax.numpy as jnp
from jax import lax
from jax.experimental import pallas as pl
from jax.experimental.pallas import tpu as pltpu


SCALE_FACTOR = 10.0
EPS = 1e-5


def _round_up(x, m):
    return ((x + m - 1) // m) * m


def _distlinear_kernel_acc(x_ref, w_ref, ix_ref, iw_ref, o_ref, acc_ref):
    # x_ref: (tm, tk), w_ref: (tn, tk), ix_ref: (tm, 1) f32, iw_ref: (1, tn) f32
    # o_ref: (tm, tn) f32, acc_ref: (tm, tn) f32 accumulator (resident across k)
    k = pl.program_id(2)

    @pl.when(k == 0)
    def _init():
        acc_ref[...] = jnp.zeros_like(acc_ref)

    # Contract last dims of both operands (rhs-transposed MXU form, no XLU pass).
    acc_ref[...] += lax.dot_general(
        x_ref[...],
        w_ref[...],
        dimension_numbers=(((1,), (1,)), ((), ())),
        preferred_element_type=jnp.float32,
    )

    @pl.when(k == pl.num_programs(2) - 1)
    def _finalize():
        # ix already carries the scale factor: ix = 10/(||x||+eps), iw = 1/(||W||+eps)
        o_ref[...] = (acc_ref[...] * ix_ref[...] * iw_ref[...]).astype(o_ref.dtype)


def _distlinear_kernel_single(x_ref, w_ref, ix_ref, iw_ref, o_ref):
    # Single k-step: no accumulator scratch, no init/finalize predicates.
    acc = lax.dot_general(
        x_ref[...],
        w_ref[...],
        dimension_numbers=(((1,), (1,)), ((), ())),
        preferred_element_type=jnp.float32,
    )
    o_ref[...] = (acc * ix_ref[...] * iw_ref[...]).astype(o_ref.dtype)


def _vmem_limit_bytes(tm, tn, tk, kt, operand_bytes):
    # Double-buffered input/output tiles + norm vectors + accumulator scratch,
    # with 2x headroom. Ceiling is generation-aware (v7x: 64 MiB physical).
    tiles = (
        2 * (tm * tk + tn * tk) * operand_bytes   # x/W tiles, double buffered
        + 2 * tm * tn * 4                          # output tile, double buffered
        + 2 * (tm + tn) * 4                        # inv_x / inv_w vectors
    )
    scratch = tm * tn * 4 if kt > 1 else 0
    need = 2 * (tiles + scratch)
    try:
        cap = int(pltpu.get_tpu_info().vmem_capacity_bytes)
    except Exception:
        cap = 64 * 1024 * 1024
    ceiling = min(int(cap * 0.8), 100 * 1024 * 1024)
    return int(min(max(need, 32 * 1024 * 1024), ceiling))


def dist_linear(x, weight, *, tm=512, tn=512, tk=1024, operand_dtype=jnp.bfloat16):
    """x: [B, D], weight: [O, D] (nn.Linear layout) -> scores [B, O] float32."""
    B, D = x.shape
    O, D_w = weight.shape
    assert D == D_w, "feature dims must match"

    x = x.astype(jnp.float32)
    weight = weight.astype(jnp.float32)

    operand_bytes = jnp.dtype(operand_dtype).itemsize
    m_align = 16 if operand_bytes < 4 else 8     # bf16 packs 16 rows per vreg

    # (8,128)-aligned, lane-dense tiles, clamped to the padded problem size.
    tm = min(_round_up(tm, m_align), _round_up(B, m_align))
    tn = min(_round_up(tn, 128), _round_up(O, 128))
    tk = min(_round_up(tk, 128), _round_up(D, 128))

    Bp, Op, Dp = _round_up(B, tm), _round_up(O, tn), _round_up(D, tk)

    # v7x has 2 TensorCores: make sure the parallel (i, j) grid has >= 2 tiles.
    if (Bp // tm) * (Op // tn) == 1:
        if tn >= 256 and tn % 256 == 0:
            tn //= 2
            Op = _round_up(O, tn)
        elif tm >= 2 * m_align and tm % (2 * m_align) == 0:
            tm //= 2
            Bp = _round_up(B, tm)

    kt = Dp // tk

    # Exact f32 row norms, computed once in the wrapper (hoisted out of the
    # hot loop; independent of the bf16 operand cast). inv_x carries the scale.
    inv_x = SCALE_FACTOR / (jnp.linalg.norm(x, axis=1, keepdims=True) + EPS)      # (B, 1)
    inv_w = (1.0 / (jnp.linalg.norm(weight, axis=1, keepdims=True) + EPS)).T       # (1, O)
    inv_x = jnp.pad(inv_x, ((0, Bp - B), (0, 0)))
    inv_w = jnp.pad(inv_w, ((0, 0), (0, Op - O)))

    # Zero padding is exact (padded rows/cols contribute 0 and are sliced off);
    # bf16 cast at the boundary halves HBM traffic for x/W.
    xp = jnp.pad(x, ((0, Bp - B), (0, Dp - D))).astype(operand_dtype)
    wp = jnp.pad(weight, ((0, Op - O), (0, Dp - D))).astype(operand_dtype)

    if kt == 1:
        grid = (Bp // tm, Op // tn)
        in_specs = [
            pl.BlockSpec((tm, tk), lambda i, j: (i, 0)),
            pl.BlockSpec((tn, tk), lambda i, j: (j, 0)),
            pl.BlockSpec((tm, 1), lambda i, j: (i, 0)),
            pl.BlockSpec((1, tn), lambda i, j: (0, j)),
        ]
        out_specs = pl.BlockSpec((tm, tn), lambda i, j: (i, j))
        scratch_shapes = []
        kernel = _distlinear_kernel_single
        dim_sem = ("parallel", "parallel")
    else:
        grid = (Bp // tm, Op // tn, kt)
        in_specs = [
            pl.BlockSpec((tm, tk), lambda i, j, k: (i, k)),
            pl.BlockSpec((tn, tk), lambda i, j, k: (j, k)),
            pl.BlockSpec((tm, 1), lambda i, j, k: (i, 0)),
            pl.BlockSpec((1, tn), lambda i, j, k: (0, j)),
        ]
        out_specs = pl.BlockSpec((tm, tn), lambda i, j, k: (i, j))
        scratch_shapes = [pltpu.VMEM((tm, tn), jnp.float32)]
        kernel = _distlinear_kernel_acc
        dim_sem = ("parallel", "parallel", "arbitrary")

    out = pl.pallas_call(
        kernel,
        out_shape=jax.ShapeDtypeStruct((Bp, Op), jnp.float32),
        grid_spec=pltpu.PrefetchScalarGridSpec(
            num_scalar_prefetch=0,
            grid=grid,
            in_specs=in_specs,
            out_specs=out_specs,
            scratch_shapes=scratch_shapes,
        ),
        compiler_params=pltpu.CompilerParams(
            dimension_semantics=dim_sem,
            vmem_limit_bytes=_vmem_limit_bytes(tm, tn, tk, kt, operand_bytes),
        ),
    )(xp, wp, inv_x, inv_w)

    return out[:B, :O]


def _reference(x, weight):
    # Pure-JAX mirror of the PyTorch forward.
    x_norm = jnp.linalg.norm(x, axis=1, keepdims=True)
    x_n = x / (x_norm + EPS)
    w_norm = jnp.linalg.norm(weight, axis=1, keepdims=True)
    w_n = weight / (w_norm + EPS)
    return SCALE_FACTOR * (x_n @ w_n.T)


if __name__ == "__main__":
    key = jax.random.PRNGKey(0)
    k1, k2, k3, k4 = jax.random.split(key, 4)

    # Test 1: module-sized toy shapes (batch=8, input_size=32, output_size=16).
    # D fits a single K tile -> exercises the no-scratch 2-D-grid kernel.
    B, D, O = 8, 32, 16
    x = jax.random.normal(k1, (B, D), dtype=jnp.float32)
    w = jax.random.normal(k2, (O, D), dtype=jnp.float32) * (1.0 / jnp.sqrt(D))
    ref = _reference(x, w)

    scores = jax.block_until_ready(dist_linear(x, w))                      # bf16 default
    assert scores.shape == (B, O)
    assert jnp.allclose(scores, ref, atol=1e-1, rtol=5e-2), "bf16 mismatch (small)"

    scores_f32 = jax.block_until_ready(dist_linear(x, w, operand_dtype=jnp.float32))
    assert jnp.allclose(scores_f32, ref, atol=2e-3, rtol=1e-3), "f32 mismatch (small)"

    # Test 2: multi-tile (3x3x3) grid exercising padding + K accumulation.
    B2, D2, O2 = 48, 384, 272
    x2 = jax.random.normal(k3, (B2, D2), dtype=jnp.float32)
    w2 = jax.random.normal(k4, (O2, D2), dtype=jnp.float32) * (1.0 / jnp.sqrt(D2))
    ref2 = _reference(x2, w2)

    s2 = jax.block_until_ready(dist_linear(x2, w2, tm=16, tn=128, tk=128))
    assert s2.shape == (B2, O2)
    assert jnp.allclose(s2, ref2, atol=1e-1, rtol=5e-2), "bf16 mismatch (tiled)"

    s2f = jax.block_until_ready(
        dist_linear(x2, w2, tm=16, tn=128, tk=128, operand_dtype=jnp.float32)
    )
    assert jnp.allclose(s2f, ref2, atol=2e-3, rtol=1e-3), "f32 mismatch (tiled)"

    print("KERNEL_OK")
</pallas_src>

<mosaic_0001>
module attributes {stable_mosaic.version = 11 : i64} {
  func.func @_distlinear_kernel_single(%arg0: i32, %arg1: i32, %arg2: memref<16x128xbf16, #tpu.memory_space<vmem>>, %arg3: memref<128x128xbf16, #tpu.memory_space<vmem>>, %arg4: memref<16x1xf32, #tpu.memory_space<vmem>>, %arg5: memref<1x128xf32, #tpu.memory_space<vmem>>, %arg6: memref<16x128xf32, #tpu.memory_space<vmem>>) attributes {dimension_semantics = [#tpu.dimension_semantics<parallel>, #tpu.dimension_semantics<parallel>], iteration_bounds = array<i64: 1, 1>, scalar_prefetch = 0 : i64, scratch_operands = 0 : i64, tpu.core_type = #tpu.core_type<tc>, window_params = [{transform_indices = @transform_0, window_bounds = array<i64: 16, 128>}, {transform_indices = @transform_1, window_bounds = array<i64: 128, 128>}, {transform_indices = @transform_2, window_bounds = array<i64: 16, 1>}, {transform_indices = @transform_3, window_bounds = array<i64: 1, 128>}, {transform_indices = @transform_4, window_bounds = array<i64: 16, 128>}]} {
    %c0 = arith.constant 0 : index
    %c0_0 = arith.constant 0 : index
    %0 = vector.load %arg2[%c0, %c0_0] : memref<16x128xbf16, #tpu.memory_space<vmem>>, vector<16x128xbf16>
    %c0_1 = arith.constant 0 : index
    %c0_2 = arith.constant 0 : index
    %1 = vector.load %arg3[%c0_1, %c0_2] : memref<128x128xbf16, #tpu.memory_space<vmem>>, vector<128x128xbf16>
    %cst = arith.constant dense<0.000000e+00> : vector<16x128xf32>
    %2 = tpu.matmul %0, %1, %cst {dimension_numbers = #tpu.dot_dimension_numbers<[1], [1], [0], [0], [0, 0, 1, 0], [], []>} : vector<16x128xbf16>, vector<128x128xbf16>, vector<16x128xf32> -> vector<16x128xf32>
    %c0_3 = arith.constant 0 : index
    %c0_4 = arith.constant 0 : index
    %3 = vector.load %arg4[%c0_3, %c0_4] : memref<16x1xf32, #tpu.memory_space<vmem>>, vector<16x1xf32>
    %4 = vector.broadcast %3 : vector<16x1xf32> to vector<16x128xf32>
    %5 = arith.mulf %2, %4 : vector<16x128xf32>
    %c0_5 = arith.constant 0 : index
    %c0_6 = arith.constant 0 : index
    %6 = vector.load %arg5[%c0_5, %c0_6] : memref<1x128xf32, #tpu.memory_space<vmem>>, vector<1x128xf32>
    %7 = vector.broadcast %6 : vector<1x128xf32> to vector<16x128xf32>
    %8 = arith.mulf %5, %7 : vector<16x128xf32>
    %c0_7 = arith.constant 0 : index
    %c0_8 = arith.constant 0 : index
    %9 = vector.load %arg6[%c0_7, %c0_8] : memref<16x128xf32, #tpu.memory_space<vmem>>, vector<16x128xf32>
    tpu.vector_store %arg6[%c0_7, %c0_8], %8 {strides = array<i32>} : memref<16x128xf32, #tpu.memory_space<vmem>>, vector<16x128xf32>,
    return
  }
  func.func @transform_0(%arg0: i32, %arg1: i32) -> (i32, i32) {
    %c0_i32 = arith.constant 0 : i32
    %c0_i32_0 = arith.constant 0 : i32
    return %arg0, %c0_i32 : i32, i32
  }
  func.func @transform_1(%arg0: i32, %arg1: i32) -> (i32, i32) {
    %c0_i32 = arith.constant 0 : i32
    %c0_i32_0 = arith.constant 0 : i32
    return %arg1, %c0_i32 : i32, i32
  }
  func.func @transform_2(%arg0: i32, %arg1: i32) -> (i32, i32) {
    %c0_i32 = arith.constant 0 : i32
    %c0_i32_0 = arith.constant 0 : i32
    return %arg0, %c0_i32 : i32, i32
  }
  func.func @transform_3(%arg0: i32, %arg1: i32) -> (i32, i32) {
    %c0_i32 = arith.constant 0 : i32
    %c0_i32_0 = arith.constant 0 : i32
    return %c0_i32, %arg1 : i32, i32
  }
  func.func @transform_4(%arg0: i32, %arg1: i32) -> (i32, i32) {
    %c0_i32 = arith.constant 0 : i32
    return %arg0, %arg1 : i32, i32
  }
}

</mosaic_0001>

<bundles_post_ra>
// kernel: tpu_custom_call.1
= control target key start
LH: loop header
LB: loop body
LE: loop exit
PB: predicated region body
PF: predicated region fallthrough
CT: control target
= control target key end

     0   :  { %9 = vsyncpa [#allocation3], 0  ;;  %s364_s0 = inlined_call_operand.vmem [shape: bf16[16,128], index: 0, kind: input, shape index: {}]   ;;  %s365_s1 = inlined_call_operand.hbm [shape: bf16[128,128], index: 1, kind: input, shape index: {}]   ;;  %s366_s2 = inlined_call_operand.vmem [shape: f32[16,1], index: 2, kind: input, shape index: {}]   ;;  %s367_s3 = inlined_call_operand.vmem [shape: f32[1,128], index: 3, kind: input, shape index: {}]   ;;  %s368_s4 = inlined_call_operand.hbm [shape: f32[16,128], index: 4, kind: output, shape index: {}]  }
   0x1   :  { %10 = vsyncpa [#allocation4], 0  ;;  %s294_s15 = smov [#allocation2]   ;;  %s246_s19 = scalar_lea.hbm %s365_s1, 1024 }
   0x2   :  { %s18_s16 = sshll.u32 %s294_s15, 4  ;;  %p247_p0 = scmp.ne.s32.totalorder %s365_s1, %s246_s19  ;;  %s19_s16 = int_to_ptr.vmem [resolvable:$true] %s18_s16 }
   0x3   :  { %p250_p1 = scmp.lt.u32.totalorder %s246_s19, %s365_s1 }
   0x5   :  { %p252_p2 = pnand %p250_p1, %p247_p0 }
   0x7   :  { %255 = shalt.err (!%p252_p2)
}
   0x8   :  { %s256_s24 = scalar_lea.vmem %s19_s16, 1024  ;;  %p261_p4 = scmp.lt.s32.totalorder %s19_s16, %s19_s16 }
   0x9   :  { %p257_p3 = scmp.ne.s32.totalorder %s19_s16, %s256_s24  ;;  %p262_p5 = scmp.lt.s32.totalorder %s256_s24, %s256_s24 }
   0xb   :  { %p263_p6 = por %p262_p5, %p261_p4 }
   0xd   :  { %p264_p7 = pnand %p263_p6, %p257_p3 }
   0xf   :  { %267 = shalt.err (!%p264_p7)
}
  0x10   :  { %s295_s25 = smov 64   ;;  %s296_s26 = smov 4  }
  0x11   :  { %24 = dma.hbm_to_vmem [thread:$0]  %s365_s1, 1024, %s19_s16, [#allocation3], %s295_s25, %s295_s25, %s296_s26  }
  0x12   :  { %290 = dma.done.wait [#allocation3], 1024  }
  0x13   :  { %291 = vsyncadd [#allocation3], 4294966272  ;;  %v297_v0 = vmov 0.0   ;;  %vm298_vm0 = vmmov 0   ;;  %v299_v1 = vmov 0   ;;  %v237_v2 = vld [vmem:[#allocation2] sm:$0xff]  }
  0x14   :  { %207 = vmatprep.subr.bf16.mxu0 %v297_v0  ;;  %223 = vmatprep.mubr.msk.bf16.mxu0 %vm298_vm0, %v297_v0  ;;  %v238_v3 = vld [vmem:[#allocation2 + $0x8] sm:$0xff]   ;;  %v146_v4 = vld [vmem:[%s366_s2] sm:$0xff]  ;;  %v239_v6 = vld [vmem:[#allocation2 + $0x10] sm:$0xff]   ;;  %s300_s9 = smov [#allocation5]  }
  0x15   :  { %236 = vset.pattern.permute.xlu0 %v299_v1  ;;  %208 = vmatpush3.bf16.xpose.msra.mxu0 %v237_v2  ;;  %v147_v5 = vld [vmem:[%s366_s2 + $0x8] sm:$0xff]  ;;  %v240_v7 = vld [vmem:[#allocation2 + $0x18] sm:$0xff]   ;;  %v241_v8 = vld [vmem:[#allocation2 + $0x20] sm:$0xff]   ;;  %s176_s10 = sshll.u32 %s300_s9, 4  ;;  %s177_s10 = int_to_ptr.vmem [resolvable:$true] %s176_s10 }
  0x16   :  { %209 = vmatprep.subr.bf16.mxu0 %v297_v0  ;;  %150 = vperm.xlu0 %236, %v146_v4   ;;  %v242_v9 = vld [vmem:[#allocation2 + $0x28] sm:$0xff]   ;;  %v243_v10 = vld [vmem:[#allocation2 + $0x30] sm:$0xff]   ;;  %v244_v11 = vld [vmem:[#allocation2 + $0x38] sm:$0xff]   ;;  %p273_p9 = scmp.lt.s32.totalorder %s177_s10, %s177_s10 }
  0x17   :  { %v245_v12 = vld [vmem:[%s364_s0] sm:$0xff]   ;;  %s268_s0 = scalar_lea.vmem %s177_s10, 256 }
  0x18   :  { %v197_v15 = vld [vmem:[%s367_s3] ss:$0 sm:$0xff]  ;;  %p269_p8 = scmp.ne.s32.totalorder %s177_s10, %s268_s0  ;;  %p274_p10 = scmp.lt.s32.totalorder %s268_s0, %s268_s0 }
  0x1a   :  { %155 = vperm.xlu0 %236, %v147_v5   ;;  %p275_p11 = por %p274_p10, %p273_p9 }
  0x1c   :  { %p276_p12 = pnand %p275_p11, %p269_p8 }
  0x1d   :  { %210 = vmatpush3.bf16.xpose.msra.mxu0 %v238_v3 }
  0x1e   :  { %211 = vmatprep.subr.bf16.mxu0 %v297_v0 }
  0x25   :  { %212 = vmatpush3.bf16.xpose.msra.mxu0 %v239_v6 }
  0x26   :  { %213 = vmatprep.subr.bf16.mxu0 %v297_v0 }
  0x2d   :  { %214 = vmatpush3.bf16.xpose.msra.mxu0 %v240_v7 }
  0x2e   :  { %215 = vmatprep.subr.bf16.mxu0 %v297_v0 }
  0x35   :  { %216 = vmatpush3.bf16.xpose.msra.mxu0 %v241_v8 }
  0x36   :  { %217 = vmatprep.subr.bf16.mxu0 %v297_v0 }
  0x3d   :  { %218 = vmatpush3.bf16.xpose.msra.mxu0 %v242_v9 }
  0x3e   :  { %219 = vmatprep.subr.bf16.mxu0 %v297_v0 }
  0x45   :  { %220 = vmatpush3.bf16.xpose.msra.mxu0 %v243_v10 }
  0x46   :  { %221 = vmatprep.subr.bf16.mxu0 %v297_v0 }
  0x4d   :  { %222 = vmatpush3.bf16.xpose.msra.mxu0 %v244_v11 }
  0x54   :  { %224 = vmatmul.mubr.bf16.vlgmr.msra.gmra.mrb[0].mxu0 %v245_v12 }
  0x95   :  { %v151_v13 = vpop.permute.xlu0 %150 }
  0x99   :  { %v156_v18 = vpop.permute.xlu0 %155 }
 0x127   :  { %v139_v14 = vpop.f32.mrb[0].mxu0 }
 0x128   :  { %v158_v16 = vmul.f32 %v151_v13, %v139_v14  ;;  %v225_v17 = vpop.f32.mrb[1].mxu0 }
 0x129   :  { %v142_v19 = vpop.f32.mrb[2].mxu0 }
 0x12a   :  { %v167_v20 = vmul.f32 %v197_v15, %v158_v16  ;;  %v159_v21 = vmul.f32 %v156_v18, %v142_v19  ;;  %v226_v22 = vpop.f32.mrb[3].mxu0 }
 0x12c   :  { %169 = vst [vmem:[#allocation5] sm:$0xff] %v167_v20  ;;  %v168_v23 = vmul.f32 %v197_v15, %v159_v21 }
 0x12e   :  { %170 = vst [vmem:[#allocation5 + $0x8] sm:$0xff] %v168_v23 }
 0x12f   :  { %279 = shalt.err (!%p276_p12)
}
 0x130   :  { %s280_s12 = scalar_lea.hbm %s368_s4, 256 }
 0x131   :  { %p281_p13 = scmp.ne.s32.totalorder %s368_s4, %s280_s12  ;;  %p284_p0 = scmp.lt.u32.totalorder %s280_s12, %s368_s4 }
 0x133   :  { %p286_p1 = pnand %p284_p0, %p281_p13 }
 0x135   :  { %289 = shalt.err (!%p286_p1)
}
 0x136   :  { %s301_s17 = smov 128   ;;  %s302_s18 = smov 8  }
 0x137   :  { %182 = dma.vmem_to_hbm [thread:$0]  %s177_s10, 256, %s368_s4, [#allocation4], %s301_s17, %s301_s17, %s302_s18  }
 0x138   :  { %292 = dma.done.wait [#allocation4], 256  }
 0x139   :  { %293 = vsyncadd [#allocation4], 4294967040 }
 0x13a   :  { %186 = vsyncpa [#allocation3], 1 }
 0x13b   :  { %187 = vsyncpa [#allocation4], 1 }

</bundles_post_ra>
